<compile_context>
chip_gen: v7x
topology: tpu7x:2x2x1
jax: 0.10.0
libtpu: 0.0.40
codegen_flags: <defaults>
</compile_context>

<pallas_src>
import functools

import numpy as np

import jax
import jax.numpy as jnp
from jax.experimental import pallas as pl
from jax.experimental.pallas import tpu as pltpu

N_ANCHORS = 3
N_CLASSES = 80
C = 5 + N_CLASSES  # 85


def _yolo_kernel(x_ref, o_ref, *, stride, height, tile, anchors):
    """Decode one (batch, anchor, spatial-tile) block.

    x_ref : (1, 1, C, T)  raw conv outputs, channel-major, native dtype.
    o_ref : (1, 1, T, C)  decoded predictions, channel-last, f32.
    """
    a = pl.program_id(1)          # anchor index
    t = pl.program_id(2)          # spatial tile index

    x = x_ref[0, 0].astype(jnp.float32)            # (C, T), cast in-kernel

    stride_f = jnp.float32(stride)
    h_f = jnp.float32(height)

    # Absolute flattened spatial index wh = w*H + h  ->  c_x = h, c_y = w.
    idx = (t * tile
           + jax.lax.broadcasted_iota(jnp.int32, (1, tile), 1)).astype(jnp.float32)
    c_y = jnp.floor(idx / h_f)
    c_x = idx - c_y * h_f
    # Exact-integer guard against f32 division rounding drift (cheap VPU work).
    over = c_x >= h_f
    under = c_x < 0.0
    c_y = jnp.where(over, c_y + 1.0, jnp.where(under, c_y - 1.0, c_y))
    c_x = jnp.where(over, c_x - h_f, jnp.where(under, c_x + h_f, c_x))

    # Anchor (w, h) for this grid step; anchors are compile-time constants.
    aw = jnp.where(a == 0, anchors[0][0],
                   jnp.where(a == 1, anchors[1][0], anchors[2][0]))
    ah = jnp.where(a == 0, anchors[0][1],
                   jnp.where(a == 1, anchors[1][1], anchors[2][1]))

    # EUP work only where it is consumed: sigmoid on rows 0-1 and 4:, exp on 2-3.
    sig_xy = jax.nn.sigmoid(x[0:2, :])             # (2, T)
    exp_wh = jnp.exp(x[2:4, :])                    # (2, T)
    sig_oc = jax.nn.sigmoid(x[4:, :])              # (81, T) objectness + classes

    bx = (sig_xy[0:1, :] + c_x) * stride_f
    by = (sig_xy[1:2, :] + c_y) * stride_f
    half_w = (0.5 * aw) * exp_wh[0:1, :]
    half_h = (0.5 * ah) * exp_wh[1:2, :]

    full = jnp.concatenate(
        [bx - half_w, by - half_h, bx + half_w, by + half_h, sig_oc],
        axis=0)                                    # (C, T)

    # Fold the layout change into the kernel: (C, T) -> (T, C) on the XLU,
    # so the wrapper only needs a pure reshape afterwards (no extra HBM pass).
    o_ref[0, 0] = full.T.astype(o_ref.dtype)


def _pick_tile(wh):
    """Spatial tile length: lane-aligned divisor in the pipelining sweet spot."""
    for t in (8192, 4096, 2048, 1024, 512):
        if wh % t == 0:
            return t
    if wh <= 8192:
        return wh          # whole spatial axis (block dim == full dim is legal)
    return 2048            # boundary tile is padded/masked by the pipeline


def yolo_layer(inputs, anchors, img_size):
    """inputs: (B, N_ANCHORS*(5+N_CLASSES), W, H) NCHW array (any float dtype)."""
    B, ch, W, H = inputs.shape
    assert ch == N_ANCHORS * C
    WH = W * H
    stride = int(img_size) // int(W)   # integer division, like torch

    # Pure view: NCHW -> channel-major (B, A, C, W*H).  No transpose and no
    # dtype cast here (a wrapper astype would materialize a full HBM copy).
    x = inputs.reshape(B, N_ANCHORS, C, WH)

    anc = np.asarray(anchors, dtype=np.float32).reshape(N_ANCHORS, 2)
    anc_t = tuple(tuple(float(v) for v in row) for row in anc)

    T = _pick_tile(WH)
    n_t = pl.cdiv(WH, T)

    in_bytes = B * N_ANCHORS * C * WH * x.dtype.itemsize
    out_bytes = B * N_ANCHORS * C * WH * 4
    cost = pl.CostEstimate(
        flops=16 * B * N_ANCHORS * WH,
        transcendentals=B * N_ANCHORS * C * WH,
        bytes_accessed=in_bytes + out_bytes,
    )

    out = pl.pallas_call(
        functools.partial(_yolo_kernel, stride=stride, height=H, tile=T,
                          anchors=anc_t),
        out_shape=jax.ShapeDtypeStruct((B, N_ANCHORS, WH, C), jnp.float32),
        grid=(B, N_ANCHORS, n_t),
        in_specs=[pl.BlockSpec((1, 1, C, T), lambda b, a, t: (b, a, 0, t))],
        out_specs=pl.BlockSpec((1, 1, T, C), lambda b, a, t: (b, a, t, 0)),
        compiler_params=pltpu.CompilerParams(
            dimension_semantics=("parallel", "parallel", "parallel")),
        cost_estimate=cost,
    )(x)

    # Pure view to PyTorch's (B, A*W*H, 85): no wrapper transpose any more.
    return out.reshape(B, N_ANCHORS * WH, C)


def _reference(inputs, anchors, img_size):
    # Pure-JAX mirror of the PyTorch forward, for a correctness check.
    B, ch, W, H = inputs.shape
    x = inputs.reshape(B, N_ANCHORS, C, W, H).transpose(0, 1, 3, 4, 2)
    t_xy, t_wh = x[..., 0:2], x[..., 2:4]
    obj = jax.nn.sigmoid(x[..., 4:5])
    cls = jax.nn.sigmoid(x[..., 5:])
    yv, xv = jnp.meshgrid(jnp.arange(W), jnp.arange(H), indexing="ij")
    c_xy = jnp.stack([xv, yv], axis=2).reshape(1, 1, W, H, 2).astype(jnp.float32)
    stride = img_size // W
    b_xy = (jax.nn.sigmoid(t_xy) + c_xy) * stride
    b_wh = jnp.exp(t_wh) * anchors.reshape(1, N_ANCHORS, 1, 1, 2)
    x1y1 = b_xy - b_wh / 2.0
    x2y2 = b_xy + b_wh / 2.0
    boxes = jnp.concatenate([x1y1, x2y2], axis=-1).reshape(B, -1, 4)
    return jnp.concatenate(
        [boxes, obj.reshape(B, -1, 1), cls.reshape(B, -1, N_CLASSES)], axis=-1)


if __name__ == "__main__":
    key = jax.random.PRNGKey(0)
    B, W, H = 2, 16, 16
    img_size = 512

    inputs = jax.random.normal(key, (B, N_ANCHORS * C, W, H), dtype=jnp.float32)
    anchors = jnp.array([[10.0, 13.0], [16.0, 30.0], [33.0, 23.0]],
                        dtype=jnp.float32)

    pred = yolo_layer(inputs, anchors, img_size)
    jax.block_until_ready(pred)

    assert pred.shape == (B, N_ANCHORS * W * H, C)
    assert pred.dtype == jnp.float32

    ref = _reference(inputs, anchors, img_size)
    assert jnp.allclose(pred, ref, rtol=1e-3, atol=1e-3), \
        float(jnp.max(jnp.abs(pred - ref)))

    print("KERNEL_OK")
</pallas_src>

<mosaic_0001>
module attributes {stable_mosaic.version = 11 : i64} {
  func.func @_yolo_kernel(%arg0: i32, %arg1: i32, %arg2: i32, %arg3: memref<1x1x85x256xf32, #tpu.memory_space<vmem>>, %arg4: memref<1x1x256x85xf32, #tpu.memory_space<vmem>>) attributes {dimension_semantics = [#tpu.dimension_semantics<parallel>, #tpu.dimension_semantics<parallel>, #tpu.dimension_semantics<parallel>], iteration_bounds = array<i64: 2, 3, 1>, scalar_prefetch = 0 : i64, scratch_operands = 0 : i64, tpu.core_type = #tpu.core_type<tc>, window_params = [{transform_indices = @transform_0, window_bounds = array<i64: 1, 1, 85, 256>}, {transform_indices = @transform_1, window_bounds = array<i64: 1, 1, 256, 85>}]} {
    %c0 = arith.constant 0 : index
    %c0_0 = arith.constant 0 : index
    %c0_1 = arith.constant 0 : index
    %c0_2 = arith.constant 0 : index
    %0 = vector.load %arg3[%c0, %c0_0, %c0_1, %c0_2] : memref<1x1x85x256xf32, #tpu.memory_space<vmem>>, vector<1x1x85x256xf32>
    %1 = vector.shape_cast %0 : vector<1x1x85x256xf32> to vector<85x256xf32>
    %c256_i32 = arith.constant 256 : i32
    %2 = arith.muli %arg2, %c256_i32 : i32
    %3 = tpu.iota {dimensions = array<i32: 1>} : vector<1x256xi32>
    %4 = vector.broadcast %2 : i32 to vector<1x256xi32>
    %5 = arith.addi %4, %3 : vector<1x256xi32>
    %6 = arith.sitofp %5 : vector<1x256xi32> to vector<1x256xf32>
    %cst = arith.constant 1.600000e+01 : f32
    %7 = vector.broadcast %cst : f32 to vector<1x256xf32>
    %8 = arith.divf %6, %7 : vector<1x256xf32>
    %9 = math.floor %8 : vector<1x256xf32>
    %cst_3 = arith.constant 1.600000e+01 : f32
    %10 = vector.broadcast %cst_3 : f32 to vector<1x256xf32>
    %11 = arith.mulf %9, %10 : vector<1x256xf32>
    %12 = arith.subf %6, %11 : vector<1x256xf32>
    %cst_4 = arith.constant 1.600000e+01 : f32
    %13 = vector.broadcast %cst_4 : f32 to vector<1x256xf32>
    %14 = arith.cmpf oge, %12, %13 : vector<1x256xf32>
    %cst_5 = arith.constant 0.000000e+00 : f32
    %15 = vector.broadcast %cst_5 : f32 to vector<1x256xf32>
    %16 = arith.cmpf olt, %12, %15 : vector<1x256xf32>
    %cst_6 = arith.constant 1.000000e+00 : f32
    %17 = vector.broadcast %cst_6 : f32 to vector<1x256xf32>
    %18 = arith.addf %9, %17 : vector<1x256xf32>
    %cst_7 = arith.constant 1.000000e+00 : f32
    %19 = vector.broadcast %cst_7 : f32 to vector<1x256xf32>
    %20 = arith.subf %9, %19 : vector<1x256xf32>
    %21 = arith.select %16, %20, %9 : vector<1x256xi1>, vector<1x256xf32>
    %22 = arith.select %14, %18, %21 : vector<1x256xi1>, vector<1x256xf32>
    %cst_8 = arith.constant 1.600000e+01 : f32
    %23 = vector.broadcast %cst_8 : f32 to vector<1x256xf32>
    %24 = arith.subf %12, %23 : vector<1x256xf32>
    %cst_9 = arith.constant 1.600000e+01 : f32
    %25 = vector.broadcast %cst_9 : f32 to vector<1x256xf32>
    %26 = arith.addf %12, %25 : vector<1x256xf32>
    %27 = arith.select %16, %26, %12 : vector<1x256xi1>, vector<1x256xf32>
    %28 = arith.select %14, %24, %27 : vector<1x256xi1>, vector<1x256xf32>
    %c0_i32 = arith.constant 0 : i32
    %29 = arith.cmpi eq, %arg1, %c0_i32 : i32
    %c1_i32 = arith.constant 1 : i32
    %30 = arith.cmpi eq, %arg1, %c1_i32 : i32
    %cst_10 = arith.constant 1.600000e+01 : f32
    %cst_11 = arith.constant 3.300000e+01 : f32
    %31 = arith.select %30, %cst_10, %cst_11 : f32
    %cst_12 = arith.constant 1.000000e+01 : f32
    %32 = arith.select %29, %cst_12, %31 : f32
    %c0_i32_13 = arith.constant 0 : i32
    %33 = arith.cmpi eq, %arg1, %c0_i32_13 : i32
    %c1_i32_14 = arith.constant 1 : i32
    %34 = arith.cmpi eq, %arg1, %c1_i32_14 : i32
    %cst_15 = arith.constant 3.000000e+01 : f32
    %cst_16 = arith.constant 2.300000e+01 : f32
    %35 = arith.select %34, %cst_15, %cst_16 : f32
    %cst_17 = arith.constant 1.300000e+01 : f32
    %36 = arith.select %33, %cst_17, %35 : f32
    %37 = vector.extract_strided_slice %1 {offsets = [0, 0], sizes = [2, 256], strides = [1, 1]} : vector<85x256xf32> to vector<2x256xf32>
    %38 = arith.negf %37 : vector<2x256xf32>
    %39 = math.exp %38 : vector<2x256xf32>
    %cst_18 = arith.constant 1.000000e+00 : f32
    %40 = vector.broadcast %cst_18 : f32 to vector<2x256xf32>
    %41 = arith.addf %40, %39 : vector<2x256xf32>
    %42 = arith.divf %40, %41 : vector<2x256xf32>
    %43 = vector.extract_strided_slice %1 {offsets = [2, 0], sizes = [2, 256], strides = [1, 1]} : vector<85x256xf32> to vector<2x256xf32>
    %44 = math.exp %43 : vector<2x256xf32>
    %45 = vector.extract_strided_slice %1 {offsets = [4, 0], sizes = [81, 256], strides = [1, 1]} : vector<85x256xf32> to vector<81x256xf32>
    %46 = arith.negf %45 : vector<81x256xf32>
    %47 = math.exp %46 : vector<81x256xf32>
    %cst_19 = arith.constant 1.000000e+00 : f32
    %48 = vector.broadcast %cst_19 : f32 to vector<81x256xf32>
    %49 = arith.addf %48, %47 : vector<81x256xf32>
    %50 = arith.divf %48, %49 : vector<81x256xf32>
    %51 = vector.extract_strided_slice %42 {offsets = [0, 0], sizes = [1, 256], strides = [1, 1]} : vector<2x256xf32> to vector<1x256xf32>
    %52 = arith.addf %51, %28 : vector<1x256xf32>
    %cst_20 = arith.constant 3.200000e+01 : f32
    %53 = vector.broadcast %cst_20 : f32 to vector<1x256xf32>
    %54 = arith.mulf %52, %53 : vector<1x256xf32>
    %55 = vector.extract_strided_slice %42 {offsets = [1, 0], sizes = [1, 256], strides = [1, 1]} : vector<2x256xf32> to vector<1x256xf32>
    %56 = arith.addf %55, %22 : vector<1x256xf32>
    %cst_21 = arith.constant 3.200000e+01 : f32
    %57 = vector.broadcast %cst_21 : f32 to vector<1x256xf32>
    %58 = arith.mulf %56, %57 : vector<1x256xf32>
    %cst_22 = arith.constant 5.000000e-01 : f32
    %59 = arith.mulf %cst_22, %32 : f32
    %60 = vector.extract_strided_slice %44 {offsets = [0, 0], sizes = [1, 256], strides = [1, 1]} : vector<2x256xf32> to vector<1x256xf32>
    %61 = vector.broadcast %59 : f32 to vector<1x256xf32>
    %62 = arith.mulf %61, %60 : vector<1x256xf32>
    %cst_23 = arith.constant 5.000000e-01 : f32
    %63 = arith.mulf %cst_23, %36 : f32
    %64 = vector.extract_strided_slice %44 {offsets = [1, 0], sizes = [1, 256], strides = [1, 1]} : vector<2x256xf32> to vector<1x256xf32>
    %65 = vector.broadcast %63 : f32 to vector<1x256xf32>
    %66 = arith.mulf %65, %64 : vector<1x256xf32>
    %67 = arith.subf %54, %62 : vector<1x256xf32>
    %68 = arith.subf %58, %66 : vector<1x256xf32>
    %69 = arith.addf %54, %62 : vector<1x256xf32>
    %70 = arith.addf %58, %66 : vector<1x256xf32>
    %71 = tpu.concatenate %67, %68, %69, %70, %50 in 0 : vector<1x256xf32>, vector<1x256xf32>, vector<1x256xf32>, vector<1x256xf32>, vector<81x256xf32> -> vector<85x256xf32>
    %72 = tpu.transpose %71, [1, 0] : vector<85x256xf32> -> vector<256x85xf32>
    %c0_24 = arith.constant 0 : index
    %c0_25 = arith.constant 0 : index
    %c0_26 = arith.constant 0 : index
    %c0_27 = arith.constant 0 : index
    %73 = vector.load %arg4[%c0_24, %c0_25, %c0_26, %c0_27] : memref<1x1x256x85xf32, #tpu.memory_space<vmem>>, vector<1x1x256x85xf32>
    %74 = vector.shape_cast %73 : vector<1x1x256x85xf32> to vector<256x85xf32>
    %75 = vector.shape_cast %72 : vector<256x85xf32> to vector<1x1x256x85xf32>
    tpu.vector_store %arg4[%c0_24, %c0_25, %c0_26, %c0_27], %75 {strides = array<i32>} : memref<1x1x256x85xf32, #tpu.memory_space<vmem>>, vector<1x1x256x85xf32>,
    return
  }
  func.func @transform_0(%arg0: i32, %arg1: i32, %arg2: i32) -> (i32, i32, i32, i32) {
    %c0_i32 = arith.constant 0 : i32
    %c0_i32_0 = arith.constant 0 : i32
    return %arg0, %arg1, %c0_i32, %arg2 : i32, i32, i32, i32
  }
  func.func @transform_1(%arg0: i32, %arg1: i32, %arg2: i32) -> (i32, i32, i32, i32) {
    %c0_i32 = arith.constant 0 : i32
    %c0_i32_0 = arith.constant 0 : i32
    return %arg0, %arg1, %arg2, %c0_i32 : i32, i32, i32, i32
  }
}

</mosaic_0001>

<bundles_post_ra>
// kernel: tpu_custom_call.1
= control target key start
LH: loop header
LB: loop body
LE: loop exit
PB: predicated region body
PF: predicated region fallthrough
CT: control target
= control target key end

     0   :  { %s883_s6 = smov 0   ;;  %s885_s7 = smov 0   ;;  %s1087_s0 = inlined_call_operand.vmem [shape: f32[2,3,85,256], index: 0, kind: input, shape index: {}]   ;;  %s1088_s1 = inlined_call_operand.vmem [shape: f32[2,3,256,85], index: 1, kind: output, shape index: {}]  }
   0x1   :  { %s887_s8 = smov 0   ;;  %s889_s9 = smov 0  }
   0x2   :  { %s891_s10 = smov 0  }
   0x3 LB: > { %s26_s11 = sadd.s32 1, %s863_s8  ;;  %s30_s12 = sadd.s32 1, %s867_s9  ;;  %s871_s10 = sphi %s891_s10, %s11_s10   ;;  %s867_s9 = sphi %s889_s9, %s1092_s9   ;;  %s863_s8 = sphi %s887_s8, %s1091_s8   ;;  %s859_s7 = sphi %s885_s7, %s1090_s7   ;;  %s855_s6 = sphi %s883_s6, %s1089_s6  }
   0x4   : > { %p28_p0 = scmp.ge.s32.totalorder %s26_s11, 3  ;;  %p665_p1 = scmp.ge.s32.totalorder %s871_s10, 1 }
   0x5   : > { %p123_p2 = scmp.lt.s32.totalorder %s871_s10, 7 }
   0x6   : > { %s1094_s11 = smov (%p28_p0, %s26_s11), 0  ;;  %s1096_s12 = smov (!%p28_p0, %s30_s12), %s867_s9 }
   0x7   : > { %p124_p3 = pnand %p665_p1, %p123_p2  ;;  %p32_p4 = scmp.ge.s32.totalorder %s1096_s12, 2 }
   0x8   : > { %p160_p5 = scmp.lt.s32.totalorder (!%p124_p3), %s859_s7, 1  ;;  %p162_p6 = scmp.lt.s32.totalorder (!%p124_p3), %s855_s6, 2  ;;  %v210_v0 = vlaneseq (!%p124_p3)  ;;  %vm437_vm4 = vcmask (!%p124_p3), 1040384   ;;  %vm440_vm5 = vcmask (!%p124_p3), 1041408   ;;  %vm443_vm6 = vcmask (!%p124_p3), 1042432  }
   0x9   : > { %s1098_s12 = smov (%p32_p4, %s1096_s12), 0  ;;  %127 = sbr.rel (%p124_p3) target bundleno = 255 (0xff), region = 24 }
   0xa   : > { %v211_v1 = vand.u32 (!%p124_p3), 127, %v210_v0  ;;  %p248_p7 = scmp.eq.s32.totalorder (!%p124_p3), %s855_s6, 1  ;;  %p247_p8 = scmp.eq.s32.totalorder (!%p124_p3), %s855_s6, 0  ;;  %vm446_vm7 = vcmask (!%p124_p3), 1043456   ;;  %vm513_vm8 = vcmask (!%p124_p3), 695296  }
   0xc   : > { %v212_v2 = vadd.s32 (!%p124_p3), 128, %v211_v1  ;;  %v216_v4 = vcvt.s32.f32 (!%p124_p3), %v211_v1 }
   0xe   : > { %v217_v3 = vcvt.s32.f32 (!%p124_p3), %v212_v2  ;;  %v219_v9 = vmul.f32 (!%p124_p3), 0.0625, %v216_v4 }
  0x10   : > { %s1100_s7 = smov (!%p160_p5, %s859_s7), 1  ;;  %v220_v7 = vmul.f32 0.0625, %v217_v3  ;;  %v930_v13 = vfloor.f32 %v219_v9 }
  0x11   : > { %s163_s13 = scalar_select %p162_p6, %s855_s6, 2 }
  0x12   : > { %s698_s14 = smul.u32 66, %s1100_s7  ;;  %v927_v12 = vfloor.f32 %v220_v7  ;;  %v223_v21 = vmul.f32 16.0, %v930_v13  ;;  %v231_v35 = vadd.f32 1.0, %v930_v13  ;;  %v669_v38 = vadd.f32 -1.0, %v930_v13 }
  0x13   : > { %s697_s15 = smul.u32 22, %s163_s13  ;;  %s667_s16 = sshll.u32 %s163_s13, 5 }
  0x14   : > { %s699_s17 = smul.u32 96, %s1100_s7  ;;  %v224_v20 = vmul.f32 16.0, %v927_v12  ;;  %v953_v31 = vsub.f32 %v216_v4, %v223_v21  ;;  %v232_v37 = vadd.f32 1.0, %v927_v12  ;;  %v670_v41 = vadd.f32 -1.0, %v927_v12 }
  0x15   : > { %s169_s18 = sadd.s32 %s698_s14, %s697_s15 }
  0x16   : > { %s666_s19 = sshll.u32 %s169_s18, 3  ;;  %s917_s20 = sadd.s32 %s699_s17, %s667_s16  ;;  %v226_v30 = vsub.f32 %v217_v3, %v224_v20  ;;  %vm227_vm0 = vcmp.ge.f32.partialorder %v953_v31, 16.0  ;;  %v241_v45 = vadd.f32 16.0, %v953_v31  ;;  %vm229_vm3 = vcmp.lt.f32.partialorder %v953_v31, 0.0 }
  0x17   : > { %s922_s23 = scalar_lea.vmem %s1087_s0, %s666_s19  ;;  %v671_v51 = vadd.f32 -16.0, %v953_v31  ;;  %v235_v62 = vsel %vm229_vm3, %v669_v38, %v930_v13  ;;  %s668_s28 = sshll.u32 %s917_s20, 3 }
  0x18   : > { %v188_v5 = vld [vmem:[%s922_s23 + $0x8] sm:$0xff]  ;;  %v187_v6 = vld [vmem:[%s922_s23] sm:$0xff]  ;;  %s249_s24 = scalar_select %p248_p7, 16.0, 33.0  ;;  %v190_v15 = vld [vmem:[%s922_s23 + $0x18] sm:$0xff]  ;;  %v242_v44 = vadd.f32 16.0, %v226_v30  ;;  %v243_v63 = vsel %vm229_vm3, %v241_v45, %v953_v31 }
  0x19   : > { %v674_v8 = vmul.f32 -1.442695, %v188_v5  ;;  %v673_v10 = vmul.f32 -1.442695, %v187_v6  ;;  %v267_v11 = vmul.f32 1.442695, %v188_v5  ;;  %s1006_s2 = scalar_lea.vmem %s1088_s1, %s668_s28 }
  0x1a   : > { %v265_v14 = vmul.f32 1.442695, %v187_v6  ;;  %v189_v16 = vld [vmem:[%s922_s23 + $0x10] sm:$0xff]  ;;  %v192_v17 = vld [vmem:[%s922_s23 + $0x28] sm:$0xff]  ;;  %v191_v18 = vld [vmem:[%s922_s23 + $0x20] sm:$0xff]  ;;  %s1102_s24 = smov (%p247_p8, %s249_s24), 10.0 }
  0x1b   : > { %741 = vpow2.f32 %v674_v8  ;;  %s251_s25 = scalar_select %p248_p7, 30.0, 23.0  ;;  %v194_v19 = vld [vmem:[%s922_s23 + $0x38] sm:$0xff]  ;;  %v676_v22 = vmul.f32 -1.442695, %v190_v15  ;;  %v193_v26 = vld [vmem:[%s922_s23 + $0x30] sm:$0xff] }
  0x1c   : > { %743 = vpow2.f32 %v673_v10  ;;  %v675_v23 = vmul.f32 -1.442695, %v189_v16  ;;  %v678_v24 = vmul.f32 -1.442695, %v192_v17  ;;  %v677_v25 = vmul.f32 -1.442695, %v191_v18 }
  0x1d   : > { %745 = vpow2.f32 %v267_v11  ;;  %v680_v27 = vmul.f32 -1.442695, %v194_v19  ;;  %s1104_s25 = smov (%p247_p8, %s251_s25), 13.0  ;;  %v196_v28 = vld [vmem:[%s922_s23 + $0x48] sm:$0xff]  ;;  %v679_v32 = vmul.f32 -1.442695, %v193_v26  ;;  %v237_v10 = vsel %vm227_vm0, %v231_v35, %v235_v62 }
  0x1e   : > { %747 = vpow2.f32 %v265_v14  ;;  %v195_v33 = vld [vmem:[%s922_s23 + $0x40] sm:$0xff]  ;;  %s397_s26 = smul.f32 0.5, %s1102_s24  ;;  %v682_v39 = vmul.f32 -1.442695, %v196_v28  ;;  %v198_v40 = vld [vmem:[%s922_s23 + $0x58] sm:$0xff]  ;;  %v197_v46 = vld [vmem:[%s922_s23 + $0x50] sm:$0xff]  ;;  %v245_v11 = vsel %vm227_vm0, %v671_v51, %v243_v63 }
  0x1f   : > { %749 = vpow2.f32 %v676_v22  ;;  %s401_s27 = smul.f32 0.5, %s1104_s25  ;;  %v681_v43 = vmul.f32 -1.442695, %v195_v33  ;;  %vm230_vm1 = vcmp.lt.f32.partialorder %v226_v30, 0.0  ;;  %v684_v49 = vmul.f32 -1.442695, %v198_v40 }
  0x20   : > { %751 = vpow2.f32 %v675_v23  ;;  %v398_v48 = vstv %s397_s26  ;;  %v200_v50 = vld [vmem:[%s922_s23 + $0x68] sm:$0xff]  ;;  %vm228_vm2 = vcmp.ge.f32.partialorder %v226_v30, 16.0  ;;  %v672_v53 = vadd.f32 -16.0, %v226_v30 }
  0x21   : > { %753 = vpow2.f32 %v678_v24  ;;  %v402_v54 = vstv %s401_s27  ;;  %v683_v55 = vmul.f32 -1.442695, %v197_v46  ;;  %v236_v57 = vsel %vm230_vm1, %v670_v41, %v927_v12 }
  0x22   : > { %755 = vpow2.f32 %v677_v25  ;;  %v244_v58 = vsel %vm230_vm1, %v242_v44, %v226_v30  ;;  %v686_v60 = vmul.f32 -1.442695, %v200_v50  ;;  %v238_v5 = vsel %vm228_vm2, %v232_v37, %v236_v57 }
  0x23   : > { %757 = vpow2.f32 %v680_v27  ;;  %v246_v6 = vsel %vm228_vm2, %v672_v53, %v244_v58 }
  0x25   : > { %v742_v29 = vpop.eup %741 }
  0x26   : > { %v260_v34 = vadd.f32 1.0, %v742_v29  ;;  %v744_v36 = vpop.eup %743 }
  0x27   : > { %v259_v42 = vadd.f32 1.0, %v744_v36  ;;  %v746_v47 = vpop.eup %745 }
  0x28   : > { %759 = vrcp.f32 %v260_v34  ;;  %v748_v52 = vpop.eup %747  ;;  %v400_v59 = vmul.f32 %v746_v47, %v398_v48  ;;  %v404_v2 = vmul.f32 %v746_v47, %v402_v54 }
  0x29   : > { %761 = vpow2.f32 %v679_v32  ;;  %v750_v56 = vpop.eup %749  ;;  %v399_v13 = vmul.f32 %v748_v52, %v398_v48  ;;  %v403_v14 = vmul.f32 %v748_v52, %v402_v54  ;;  %v201_v54 = vld [vmem:[%s922_s23 + $0x70] sm:$0xff] }
  0x2a   : > { %763 = vrcp.f32 %v259_v42  ;;  %v752_v61 = vpop.eup %751  ;;  %v330_v0 = vadd.f32 1.0, %v750_v56  ;;  %v408_v9 = vrot.slane %v400_v59, 2  ;;  %v416_v19 = vrot.slane %v404_v2, 2 }
  0x2b   : > { %765 = vpow2.f32 %v682_v39  ;;  %v754_v1 = vpop.eup %753  ;;  %v329_v3 = vadd.f32 1.0, %v752_v61  ;;  %v407_v28 = vrot.slane %v399_v13, 2  ;;  %v415_v29 = vrot.slane %v403_v14, 2  ;;  %v199_v39 = vld [vmem:[%s922_s23 + $0x60] sm:$0xff] }
  0x2c   : > { %767 = vpow2.f32 %v681_v43  ;;  %v756_v4 = vpop.eup %755  ;;  %v332_v7 = vadd.f32 1.0, %v754_v1  ;;  %v685_v53 = vmul.f32 -1.442695, %v199_v39 }
  0x2d   : > { %769 = vpow2.f32 %v684_v49  ;;  %v758_v8 = vpop.eup %757  ;;  %v331_v15 = vadd.f32 1.0, %v756_v4  ;;  %v202_v49 = vld [vmem:[%s922_s23 + $0x78] sm:$0xff] }
  0x2e   : > { %771 = vpow2.f32 %v683_v55  ;;  %v334_v21 = vadd.f32 1.0, %v758_v8  ;;  %v688_v63 = vmul.f32 -1.442695, %v202_v49  ;;  %v206_v4 = vld [vmem:[%s922_s23 + $0x98] sm:$0xff] }
  0x2f   : > { %773 = vpow2.f32 %v686_v60  ;;  %v204_v60 = vld [vmem:[%s922_s23 + $0x88] sm:$0xff] }
  0x30   : > { %775 = vrcp.f32 %v330_v0  ;;  %v203_v0 = vld [vmem:[%s922_s23 + $0x80] sm:$0xff] }
  0x31   : > { %777 = vrcp.f32 %v329_v3  ;;  %v687_v3 = vmul.f32 -1.442695, %v201_v54 }
  0x32   : > { %v760_v12 = vpop.eup %759  ;;  %779 = vrcp.f32 %v332_v7 }
  0x33   : > { %v762_v16 = vpop.eup %761  ;;  %v390_v17 = vadd.f32 %v760_v12, %v246_v6  ;;  %v394_v18 = vadd.f32 %v760_v12, %v238_v5  ;;  %781 = vrcp.f32 %v331_v15  ;;  %v690_v6 = vmul.f32 -1.442695, %v204_v60 }
  0x34   : > { %v980_v20 = vpop.eup %763  ;;  %v333_v30 = vadd.f32 1.0, %v762_v16  ;;  %783 = vrcp.f32 %v334_v21 }
  0x35   : > { %v766_v22 = vpop.eup %765  ;;  %v392_v23 = vmul.f32 32.0, %v390_v17  ;;  %v396_v24 = vmul.f32 32.0, %v394_v18  ;;  %v389_v25 = vadd.f32 %v980_v20, %v245_v11  ;;  %v393_v26 = vadd.f32 %v980_v20, %v237_v10  ;;  %v205_v10 = vld [vmem:[%s922_s23 + $0x90] sm:$0xff]  ;;  %v207_v17 = vld [vmem:[%s922_s23 + $0xa0] sm:$0x1f] }
  0x36   : > { %v768_v27 = vpop.eup %767  ;;  %v336_v38 = vadd.f32 1.0, %v766_v22  ;;  %785 = vrcp.f32 %v333_v30  ;;  %v692_v11 = vmul.f32 -1.442695, %v206_v4  ;;  %v691_v15 = vmul.f32 -1.442695, %v205_v10 }
  0x37   : > { %v412_v31 = vsub.f32 %v392_v23, %v408_v9  ;;  %v420_v32 = vsub.f32 %v396_v24, %v416_v19  ;;  %v422_v33 = vadd.f32 %v408_v9, %v392_v23  ;;  %v424_v34 = vadd.f32 %v416_v19, %v396_v24  ;;  %v770_v35 = vpop.eup %769 }
  0x38   : > { %v391_v36 = vmul.f32 32.0, %v389_v25  ;;  %v395_v37 = vmul.f32 32.0, %v393_v26  ;;  %v335_v43 = vadd.f32 1.0, %v768_v27  ;;  %v772_v44 = vpop.eup %771  ;;  %v338_v52 = vadd.f32 1.0, %v770_v35 }
  0x39   : > { %v428_v40 = vrot.slane %v422_v33, 6  ;;  %v434_v41 = vrot.slane %v424_v34, 6  ;;  %v439_v42 = vsel %vm437_vm4, %v412_v31, %v420_v32  ;;  %v774_v50 = vpop.eup %773  ;;  %787 = vrcp.f32 %v336_v38 }
  0x3a   : > { %v411_v45 = vsub.f32 %v391_v36, %v407_v28  ;;  %v419_v46 = vsub.f32 %v395_v37, %v415_v29  ;;  %v421_v47 = vadd.f32 %v407_v28, %v391_v36  ;;  %v423_v48 = vadd.f32 %v415_v29, %v395_v37  ;;  %v776_v55 = vpop.eup %775 }
  0x3b   : > { %v442_v51 = vsel %vm440_vm5, %v439_v42, %v428_v40  ;;  %v778_v61 = vpop.eup %777  ;;  %789 = vrcp.f32 %v335_v43  ;;  %v689_v9 = vmul.f32 -1.442695, %v203_v0  ;;  %v337_v14 = vadd.f32 1.0, %v772_v44 }
  0x3c   : > { %v445_v56 = vsel %vm443_vm6, %v442_v51, %v434_v41  ;;  %v427_v57 = vrot.slane %v421_v47, 6  ;;  %v433_v58 = vrot.slane %v423_v48, 6  ;;  %v438_v59 = vsel %vm437_vm4, %v411_v45, %v419_v46  ;;  %v780_v1 = vpop.eup %779 }
  0x3d   : > { %v448_v62 = vsel %vm446_vm7, %v445_v56, %v760_v12  ;;  %791 = vrcp.f32 %v338_v52  ;;  %v782_v7 = vpop.eup %781  ;;  %v208_v12 = vld [vmem:[%s922_s23 + $0xa8] sm:$0x1f]  ;;  %v340_v19 = vadd.f32 1.0, %v774_v50  ;;  %v693_v21 = vmul.f32 -1.442695, %v207_v17 }
  0x3e   : > { %481 = vxpose.xlu1.b32.start [1/11] (short) %v448_v62, 128  ;;  %v441_v2 = vsel %vm440_vm5, %v438_v59, %v427_v57  ;;  %793 = vpow2.f32 %v685_v53  ;;  %v784_v13 = vpop.eup %783  ;;  %v694_v16 = vmul.f32 -1.442695, %v208_v12 }
  0x3f   : > { %v444_v5 = vsel %vm443_vm6, %v441_v2, %v433_v58  ;;  %795 = vpow2.f32 %v688_v63 }
  0x40   : > { %v447_v8 = vsel %vm446_vm7, %v444_v5, %v980_v20  ;;  %797 = vpow2.f32 %v687_v3  ;;  %v786_v18 = vpop.eup %785 }
  0x41   : > { %449 = vxpose.xlu0.b32.start [1/11] (short) %v447_v8, 128  ;;  %799 = vpow2.f32 %v690_v6 }
  0x42   : > { %482 = vxpose.xlu1.b32.cont [2/11] (short) %v776_v55, 128  ;;  %801 = vpow2.f32 %v689_v9 }
  0x43   : > { %803 = vpow2.f32 %v692_v11  ;;  %v788_v20 = vpop.eup %787 }
  0x44   : > { %805 = vrcp.f32 %v337_v14 }
  0x45   : > { %450 = vxpose.xlu0.b32.cont [2/11] (short) %v778_v61, 128  ;;  %807 = vpow2.f32 %v691_v15  ;;  %v790_v22 = vpop.eup %789 }
  0x46   : > { %483 = vxpose.xlu1.b32.cont [3/11] (short) %v780_v1, 128  ;;  %809 = vpow2.f32 %v694_v16 }
  0x47   : > { %v792_v23 = vpop.eup %791  ;;  %811 = vrcp.f32 %v340_v19 }
  0x48   : > { %v794_v24 = vpop.eup %793  ;;  %813 = vpow2.f32 %v693_v21 }
  0x49   : > { %451 = vxpose.xlu0.b32.cont [3/11] (short) %v782_v7, 128  ;;  %v796_v25 = vpop.eup %795  ;;  %v339_v26 = vadd.f32 1.0, %v794_v24 }
  0x4a   : > { %484 = vxpose.xlu1.b32.cont [4/11] (short) %v784_v13, 128  ;;  %v798_v27 = vpop.eup %797  ;;  %v342_v28 = vadd.f32 1.0, %v796_v25 }
  0x4b   : > { %v800_v29 = vpop.eup %799  ;;  %815 = vrcp.f32 %v339_v26  ;;  %v341_v30 = vadd.f32 1.0, %v798_v27 }
  0x4c   : > { %v802_v31 = vpop.eup %801  ;;  %817 = vrcp.f32 %v342_v28  ;;  %v344_v32 = vadd.f32 1.0, %v800_v29 }
  0x4d   : > { %452 = vxpose.xlu0.b32.cont [4/11] (short) %v786_v18, 128  ;;  %v804_v33 = vpop.eup %803  ;;  %819 = vrcp.f32 %v341_v30  ;;  %v343_v35 = vadd.f32 1.0, %v802_v31 }
  0x4e   : > { %485 = vxpose.xlu1.b32.cont [5/11] (short) %v788_v20, 128  ;;  %v806_v34 = vpop.eup %805  ;;  %821 = vrcp.f32 %v344_v32  ;;  %v346_v37 = vadd.f32 1.0, %v804_v33 }
  0x4f   : > { %v808_v36 = vpop.eup %807  ;;  %823 = vrcp.f32 %v343_v35 }
  0x50   : > { %v810_v38 = vpop.eup %809  ;;  %v345_v40 = vadd.f32 1.0, %v808_v36  ;;  %825 = vrcp.f32 %v346_v37 }
  0x51   : > { %453 = vxpose.xlu0.b32.cont [5/11] (short) %v790_v22, 128  ;;  %v812_v39 = vpop.eup %811  ;;  %v348_v42 = vadd.f32 1.0, %v810_v38 }
  0x52   : > { %486 = vxpose.xlu1.b32.cont [6/11] (short) %v792_v23, 128  ;;  %v814_v41 = vpop.eup %813  ;;  %827 = vrcp.f32 %v345_v40 }
  0x53   : > { %v347_v45 = vadd.f32 1.0, %v814_v41  ;;  %829 = vrcp.f32 %v348_v42 }
  0x55   : > { %454 = vxpose.xlu0.b32.cont [6/11] (short) %v806_v34, 128  ;;  %v816_v43 = vpop.eup %815  ;;  %831 = vrcp.f32 %v347_v45 }
  0x56   : > { %487 = vxpose.xlu1.b32.cont [7/11] (short) %v812_v39, 128  ;;  %v818_v44 = vpop.eup %817 }
  0x57   : > { %v820_v46 = vpop.eup %819 }
  0x58   : > { %v822_v47 = vpop.eup %821 }
  0x59   : > { %455 = vxpose.xlu0.b32.cont [7/11] (short) %v816_v43, 128  ;;  %v824_v48 = vpop.eup %823 }
  0x5a   : > { %488 = vxpose.xlu1.b32.cont [8/11] (short) %v818_v44, 128  ;;  %v826_v49 = vpop.eup %825 }
  0x5c   : > { %v828_v50 = vpop.eup %827 }
  0x5d   : > { %456 = vxpose.xlu0.b32.cont [8/11] (short) %v820_v46, 128  ;;  %v830_v51 = vpop.eup %829 }
  0x5e   : > { %489 = vxpose.xlu1.b32.cont [9/11] (short) %v822_v47, 128 }
  0x5f   : > { %v832_v52 = vpop.eup %831 }
  0x61   : > { %457 = vxpose.xlu0.b32.cont [9/11] (short) %v824_v48, 128 }
  0x62   : > { %490 = vxpose.xlu1.b32.cont [10/11] (short) %v826_v49, 128 }
  0x65   : > { %458 = vxpose.xlu0.b32.cont [10/11] (short) %v828_v50, 128 }
  0x66   : > { %491 = vxpose.xlu1.b32.end [11/11] (short) %v830_v51, 128 }
  0x69   : > { %459 = vxpose.xlu0.b32.end [11/11] (short) %v832_v52, 128 }
  0xbe   : > { %v497_v53 = vpop.trf.xlu1 }
  0xbf   : > { %530 = vst.msk [vmem:[%s1006_s2 + $0x80] sm:$0xff] %vm513_vm8, %v497_v53 }
  0xc1   : > { %v465_v54 = vpop.trf.xlu0 }
  0xc2   : > { %514 = vst.msk [vmem:[%s1006_s2] sm:$0xff] %vm513_vm8, %v465_v54  ;;  %v498_v55 = vpop.trf.xlu1 }
  0xc3   : > { %531 = vst.msk [vmem:[%s1006_s2 + $0x88] sm:$0xff] %vm513_vm8, %v498_v55 }
  0xc5   : > { %v466_v56 = vpop.trf.xlu0 }
  0xc6   : > { %515 = vst.msk [vmem:[%s1006_s2 + $0x8] sm:$0xff] %vm513_vm8, %v466_v56  ;;  %v499_v57 = vpop.trf.xlu1 }
  0xc7   : > { %532 = vst.msk [vmem:[%s1006_s2 + $0x90] sm:$0xff] %vm513_vm8, %v499_v57 }
  0xc9   : > { %v467_v58 = vpop.trf.xlu0 }
  0xca   : > { %516 = vst.msk [vmem:[%s1006_s2 + $0x10] sm:$0xff] %vm513_vm8, %v467_v58  ;;  %v500_v59 = vpop.trf.xlu1 }
  0xcb   : > { %533 = vst.msk [vmem:[%s1006_s2 + $0x98] sm:$0xff] %vm513_vm8, %v500_v59 }
  0xcd   : > { %v468_v60 = vpop.trf.xlu0 }
  0xce   : > { %517 = vst.msk [vmem:[%s1006_s2 + $0x18] sm:$0xff] %vm513_vm8, %v468_v60  ;;  %v501_v61 = vpop.trf.xlu1 }
  0xcf   : > { %534 = vst.msk [vmem:[%s1006_s2 + $0xa0] sm:$0xff] %vm513_vm8, %v501_v61 }
  0xd1   : > { %v469_v62 = vpop.trf.xlu0 }
  0xd2   : > { %518 = vst.msk [vmem:[%s1006_s2 + $0x20] sm:$0xff] %vm513_vm8, %v469_v62  ;;  %v502_v63 = vpop.trf.xlu1 }
  0xd3   : > { %535 = vst.msk [vmem:[%s1006_s2 + $0xa8] sm:$0xff] %vm513_vm8, %v502_v63 }
  0xd5   : > { %v470_v0 = vpop.trf.xlu0 }
  0xd6   : > { %519 = vst.msk [vmem:[%s1006_s2 + $0x28] sm:$0xff] %vm513_vm8, %v470_v0  ;;  %v503_v1 = vpop.trf.xlu1 }
  0xd7   : > { %536 = vst.msk [vmem:[%s1006_s2 + $0xb0] sm:$0xff] %vm513_vm8, %v503_v1 }
  0xd9   : > { %v471_v2 = vpop.trf.xlu0 }
  0xda   : > { %520 = vst.msk [vmem:[%s1006_s2 + $0x30] sm:$0xff] %vm513_vm8, %v471_v2  ;;  %v504_v3 = vpop.trf.xlu1 }
  0xdb   : > { %537 = vst.msk [vmem:[%s1006_s2 + $0xb8] sm:$0xff] %vm513_vm8, %v504_v3 }
  0xdd   : > { %v472_v4 = vpop.trf.xlu0 }
  0xde   : > { %521 = vst.msk [vmem:[%s1006_s2 + $0x38] sm:$0xff] %vm513_vm8, %v472_v4  ;;  %v505_v5 = vpop.trf.xlu1 }
  0xdf   : > { %538 = vst.msk [vmem:[%s1006_s2 + $0xc0] sm:$0xff] %vm513_vm8, %v505_v5 }
  0xe1   : > { %v473_v6 = vpop.trf.xlu0 }
  0xe2   : > { %522 = vst.msk [vmem:[%s1006_s2 + $0x40] sm:$0xff] %vm513_vm8, %v473_v6  ;;  %v506_v7 = vpop.trf.xlu1 }
  0xe3   : > { %539 = vst.msk [vmem:[%s1006_s2 + $0xc8] sm:$0xff] %vm513_vm8, %v506_v7 }
  0xe5   : > { %v474_v8 = vpop.trf.xlu0 }
  0xe6   : > { %523 = vst.msk [vmem:[%s1006_s2 + $0x48] sm:$0xff] %vm513_vm8, %v474_v8  ;;  %v507_v9 = vpop.trf.xlu1 }
  0xe7   : > { %540 = vst.msk [vmem:[%s1006_s2 + $0xd0] sm:$0xff] %vm513_vm8, %v507_v9 }
  0xe9   : > { %v475_v10 = vpop.trf.xlu0 }
  0xea   : > { %524 = vst.msk [vmem:[%s1006_s2 + $0x50] sm:$0xff] %vm513_vm8, %v475_v10  ;;  %v508_v11 = vpop.trf.xlu1 }
  0xeb   : > { %541 = vst.msk [vmem:[%s1006_s2 + $0xd8] sm:$0xff] %vm513_vm8, %v508_v11 }
  0xed   : > { %v476_v12 = vpop.trf.xlu0 }
  0xee   : > { %525 = vst.msk [vmem:[%s1006_s2 + $0x58] sm:$0xff] %vm513_vm8, %v476_v12  ;;  %v509_v13 = vpop.trf.xlu1 }
  0xef   : > { %542 = vst.msk [vmem:[%s1006_s2 + $0xe0] sm:$0xff] %vm513_vm8, %v509_v13 }
  0xf1   : > { %v477_v14 = vpop.trf.xlu0 }
  0xf2   : > { %526 = vst.msk [vmem:[%s1006_s2 + $0x60] sm:$0xff] %vm513_vm8, %v477_v14  ;;  %v510_v15 = vpop.trf.xlu1 }
  0xf3   : > { %543 = vst.msk [vmem:[%s1006_s2 + $0xe8] sm:$0xff] %vm513_vm8, %v510_v15 }
  0xf5   : > { %v478_v16 = vpop.trf.xlu0 }
  0xf6   : > { %527 = vst.msk [vmem:[%s1006_s2 + $0x68] sm:$0xff] %vm513_vm8, %v478_v16  ;;  %v511_v17 = vpop.trf.xlu1 }
  0xf7   : > { %544 = vst.msk [vmem:[%s1006_s2 + $0xf0] sm:$0xff] %vm513_vm8, %v511_v17 }
  0xf9   : > { %v479_v18 = vpop.trf.xlu0 }
  0xfa   : > { %528 = vst.msk [vmem:[%s1006_s2 + $0x70] sm:$0xff] %vm513_vm8, %v479_v18  ;;  %v512_v19 = vpop.trf.xlu1 }
  0xfb   : > { %545 = vst.msk [vmem:[%s1006_s2 + $0xf8] sm:$0xff] %vm513_vm8, %v512_v19 }
  0xfd   : > { %v480_v20 = vpop.trf.xlu0 }
  0xfe   : > { %529 = vst.msk [vmem:[%s1006_s2 + $0x78] sm:$0xff] %vm513_vm8, %v480_v20 }
  0xff PF: > { %s11_s10 = sadd.s32 1, %s871_s10   ;;  %s1089_s6 = smov %s863_s8 }
 0x100   : > { %p8_p9 = scmp.ge.s32.totalorder %s11_s10, 8   ;;  %s1090_s7 = smov %s867_s9 }
 0x101   : > { %s1091_s8 = smov %s1094_s11  ;;  %s1092_s9 = smov %s1098_s12 }
 0x102   :  { %10 = sbr.rel (!%p8_p9) target bundleno = 3 (0x3), region = 54 }

</bundles_post_ra>
